<compile_context>
chip_gen: v6e
topology: v6e:2x2x1
jax: 0.10.0
libtpu: 0.0.40
codegen_flags: <defaults>
</compile_context>

<pallas_src>
import functools

import jax
import jax.numpy as jnp
from jax.experimental import pallas as pl
from jax.experimental.pallas import tpu as pltpu


def _linear_relu_kernel(x_ref, w_ref, b_ref, o_ref):
    # x_ref: (bm, Din) VMEM, w_ref: (Din, Dout) VMEM (pre-transposed),
    # b_ref: (1, Dout) VMEM (bias with `other` already folded in),
    # o_ref: (bm, Dout) VMEM.
    y = jnp.dot(x_ref[...], w_ref[...], preferred_element_type=jnp.float32)
    o_ref[...] = jnp.maximum(y + b_ref[...], 0.0).astype(o_ref.dtype)


@functools.partial(jax.jit, static_argnames=("block_b",))
def linear_sub_relu(x, weight, bias, other, *, block_b=1024):
    """x: (B, Din) f32, weight: (Dout, Din) f32 (PyTorch convention),
    bias: (Dout,) f32, other: scalar (folded into bias on host)."""
    B, Din = x.shape
    Dout = weight.shape[0]

    # One-time (16 KiB) host/XLA-side transpose so the MXU sees (M,K)x(K,N).
    w_t = jnp.asarray(weight, jnp.float32).T                      # (Din, Dout)
    # relu(x @ W.T + b - other) == relu(x @ W.T + (b - other))
    bias_eff = (jnp.asarray(bias, jnp.float32) - jnp.float32(other)).reshape(1, Dout)

    if B <= block_b:
        # Small batch: one step, block == full array dims (valid regardless of
        # (8,128) divisibility).
        bm = B
    else:
        # Large batch: 8-aligned tile, guaranteed >= 2 grid steps so both
        # TensorCores on v7x get work.  Partial trailing block is masked by
        # Pallas — no padding / slicing needed.
        half = -(-B // 2)                       # cdiv(B, 2)
        bm = min(block_b, ((half + 7) // 8) * 8)

    grid = (pl.cdiv(B, bm),)

    out = pl.pallas_call(
        _linear_relu_kernel,
        out_shape=jax.ShapeDtypeStruct((B, Dout), jnp.float32),
        grid_spec=pltpu.PrefetchScalarGridSpec(
            num_scalar_prefetch=0,
            grid=grid,
            in_specs=[
                pl.BlockSpec((bm, Din), lambda i: (i, 0)),      # x batch tile
                pl.BlockSpec((Din, Dout), lambda i: (0, 0)),    # W.T, resident
                pl.BlockSpec((1, Dout), lambda i: (0, 0)),      # fused bias, resident
            ],
            out_specs=pl.BlockSpec((bm, Dout), lambda i: (i, 0)),
        ),
        compiler_params=pltpu.CompilerParams(
            dimension_semantics=("parallel",),  # shard batch tiles across TCs (v7x)
        ),
        cost_estimate=pl.CostEstimate(
            flops=2 * B * Din * Dout,
            transcendentals=0,
            bytes_accessed=4 * (B * Din + Din * Dout + Dout + B * Dout),
        ),
    )(x, w_t, bias_eff)

    return out


if __name__ == "__main__":
    key = jax.random.PRNGKey(0)
    k_x, k_w, k_b, k_xl = jax.random.split(key, 4)

    in_features, out_features = 64, 64
    batch = 1
    other = 0.5  # the `__other__` operand: a deterministic scalar

    # Deterministic "nn.Linear(64, 64)" parameters (synthetic init).
    bound = 1.0 / float(in_features) ** 0.5
    x1 = jax.random.normal(k_x, (batch, in_features), dtype=jnp.float32)
    weight = jax.random.uniform(k_w, (out_features, in_features),
                                minval=-bound, maxval=bound, dtype=jnp.float32)
    bias = jax.random.uniform(k_b, (out_features,),
                              minval=-bound, maxval=bound, dtype=jnp.float32)

    def ref_fn(x):
        return jnp.maximum(x @ weight.T + bias - other, 0.0)

    # Module-spec shape: B=1 (single ungridded step).
    out = linear_sub_relu(x1, weight, bias, other)
    out = jax.block_until_ready(out)
    assert out.shape == (batch, out_features)
    assert jnp.allclose(out, ref_fn(x1), atol=1e-5, rtol=1e-5)

    # Exercise the gridded (>=2 steps) path with a masked partial trailing
    # block: B=1000 with block_b=384 -> bm=384, grid=3, last block 232 rows.
    x_big = jax.random.normal(k_xl, (1000, in_features), dtype=jnp.float32)
    out_big = jax.block_until_ready(
        linear_sub_relu(x_big, weight, bias, other, block_b=384))
    assert out_big.shape == (1000, out_features)
    assert jnp.allclose(out_big, ref_fn(x_big), atol=1e-5, rtol=1e-5)

    # Default large-tile path (B <= block_b=1024 -> single full-block step).
    out_big2 = jax.block_until_ready(linear_sub_relu(x_big, weight, bias, other))
    assert jnp.allclose(out_big2, ref_fn(x_big), atol=1e-5, rtol=1e-5)

    print("KERNEL_OK")
</pallas_src>

<mosaic_0001>
module attributes {stable_mosaic.version = 11 : i64} {
  func.func @_linear_relu_kernel(%arg0: i32, %arg1: memref<1x64xf32, #tpu.memory_space<vmem>>, %arg2: memref<64x64xf32, #tpu.memory_space<vmem>>, %arg3: memref<1x64xf32, #tpu.memory_space<vmem>>, %arg4: memref<1x64xf32, #tpu.memory_space<vmem>>) attributes {dimension_semantics = [#tpu.dimension_semantics<parallel>], iteration_bounds = array<i64: 1>, scalar_prefetch = 0 : i64, scratch_operands = 0 : i64, tpu.core_type = #tpu.core_type<tc>, window_params = [{transform_indices = @transform_0, window_bounds = array<i64: 1, 64>}, {pipeline_mode = #tpu.pipeline_mode<synchronous>, transform_indices = @transform_1, window_bounds = array<i64: 64, 64>}, {pipeline_mode = #tpu.pipeline_mode<synchronous>, transform_indices = @transform_2, window_bounds = array<i64: 1, 64>}, {transform_indices = @transform_3, window_bounds = array<i64: 1, 64>}]} {
    %c0 = arith.constant 0 : index
    %c0_0 = arith.constant 0 : index
    %0 = vector.load %arg1[%c0, %c0_0] : memref<1x64xf32, #tpu.memory_space<vmem>>, vector<1x64xf32>
    %c0_1 = arith.constant 0 : index
    %c0_2 = arith.constant 0 : index
    %1 = vector.load %arg2[%c0_1, %c0_2] : memref<64x64xf32, #tpu.memory_space<vmem>>, vector<64x64xf32>
    %cst = arith.constant dense<0.000000e+00> : vector<1x64xf32>
    %2 = tpu.matmul %0, %1, %cst {dimension_numbers = #tpu.dot_dimension_numbers<[1], [0], [0], [1], [0, 0, 1, 1], [], []>} : vector<1x64xf32>, vector<64x64xf32>, vector<1x64xf32> -> vector<1x64xf32>
    %c0_3 = arith.constant 0 : index
    %c0_4 = arith.constant 0 : index
    %3 = vector.load %arg3[%c0_3, %c0_4] : memref<1x64xf32, #tpu.memory_space<vmem>>, vector<1x64xf32>
    %4 = arith.addf %2, %3 : vector<1x64xf32>
    %cst_5 = arith.constant 0.000000e+00 : f32
    %5 = vector.broadcast %cst_5 : f32 to vector<1x64xf32>
    %6 = arith.maximumf %4, %5 : vector<1x64xf32>
    %c0_6 = arith.constant 0 : index
    %c0_7 = arith.constant 0 : index
    %7 = vector.load %arg4[%c0_6, %c0_7] : memref<1x64xf32, #tpu.memory_space<vmem>>, vector<1x64xf32>
    tpu.vector_store %arg4[%c0_6, %c0_7], %6 {strides = array<i32>} : memref<1x64xf32, #tpu.memory_space<vmem>>, vector<1x64xf32>,
    return
  }
  func.func @transform_0(%arg0: i32) -> (i32, i32) {
    %c0_i32 = arith.constant 0 : i32
    %c0_i32_0 = arith.constant 0 : i32
    return %arg0, %c0_i32 : i32, i32
  }
  func.func @transform_1(%arg0: i32) -> (i32, i32) {
    %c0_i32 = arith.constant 0 : i32
    %c0_i32_0 = arith.constant 0 : i32
    %c0_i32_1 = arith.constant 0 : i32
    return %c0_i32, %c0_i32_0 : i32, i32
  }
  func.func @transform_2(%arg0: i32) -> (i32, i32) {
    %c0_i32 = arith.constant 0 : i32
    %c0_i32_0 = arith.constant 0 : i32
    %c0_i32_1 = arith.constant 0 : i32
    return %c0_i32, %c0_i32_0 : i32, i32
  }
  func.func @transform_3(%arg0: i32) -> (i32, i32) {
    %c0_i32 = arith.constant 0 : i32
    %c0_i32_0 = arith.constant 0 : i32
    return %arg0, %c0_i32 : i32, i32
  }
}

</mosaic_0001>

<bundles_post_ra>
// kernel: linear_sub_relu.1
= control target key start
LH: loop header
LB: loop body
LE: loop exit
PB: predicated region body
PF: predicated region fallthrough
CT: control target
= control target key end

     0   :  { %v170_v1 = vmov 0.0   ;;  %vm171_vm0 = vmmov 0   ;;  %s226_s0 = inlined_call_operand.vmem [shape: f32[1,64], index: 0, kind: input, shape index: {}]   ;;  %s227_s1 = inlined_call_operand.vmem [shape: f32[64,64], index: 1, kind: input, shape index: {}]   ;;  %s228_s2 = inlined_call_operand.vmem [shape: f32[1,64], index: 2, kind: input, shape index: {}]   ;;  %s229_s3 = inlined_call_operand.hbm [shape: f32[1,64], index: 3, kind: output, shape index: {}]  }
   0x1   :  { %v23_v0 = vld [vmem:[%s227_s1 + $0x38] sm:$0xff]  ;;  %126 = vmatprep.subr.mxu0 %v170_v1  ;;  %v22_v2 = vld [vmem:[%s227_s1 + $0x30] sm:$0xff]  ;;  %142 = vmatprep.mubr.msk.f32.mxu0 %vm171_vm0, %v170_v1  ;;  %v21_v3 = vld [vmem:[%s227_s1 + $0x28] sm:$0xff] }
   0x2   :  { %127 = vmatpush3.msra.mxu0 %v23_v0 }
   0x3   :  { %128 = vmatprep.subr.mxu0 %v170_v1 }
   0x4   :  { %8 = vsyncpa [#allocation3], 0  ;;  %129 = vmatpush3.msra.mxu0 %v22_v2  ;;  %v20_v4 = vld [vmem:[%s227_s1 + $0x20] sm:$0xff]  ;;  %v19_v5 = vld [vmem:[%s227_s1 + $0x18] sm:$0xff]  ;;  %vm25_vm1 = vcmask 523264   ;;  %s172_s5 = smov [#allocation2]  }
   0x5   :  { %130 = vmatprep.subr.mxu0 %v170_v1  ;;  %v18_v6 = vld [vmem:[%s227_s1 + $0x10] sm:$0xff]  ;;  %v17_v7 = vld [vmem:[%s227_s1 + $0x8] sm:$0xff]  ;;  %v16_v8 = vld [vmem:[%s227_s1] sm:$0xff]  ;;  %s108_s6 = sshll.u32 %s172_s5, 4  ;;  %vm100_vm2 = vcmask 516096   ;;  %s109_s6 = int_to_ptr.vmem [resolvable:$true] %s108_s6 }
   0x6   :  { %131 = vmatpush3.msra.mxu0 %v21_v3  ;;  %v15_v9 = vld [vmem:[%s226_s0] sm:$0x1]  ;;  %s148_s1 = scalar_lea.vmem %s109_s6, 16  ;;  %s152_s0 = scalar_lea.vmem %s109_s6, 32 }
   0x7   :  { %132 = vmatprep.subr.mxu0 %v170_v1  ;;  %v24_v10 = vld [vmem:[%s228_s2] sm:$0x1]  ;;  %p149_p0 = scmp.ne.s32.totalorder %s109_s6, %s148_s1  ;;  %p153_p1 = scmp.lt.s32.totalorder %s109_s6, %s109_s6 }
   0x8   :  { %133 = vmatpush3.msra.mxu0 %v20_v4  ;;  %p154_p2 = scmp.lt.s32.totalorder %s152_s0, %s148_s1 }
   0x9   :  { %134 = vmatprep.subr.mxu0 %v170_v1 }
   0xa   :  { %135 = vmatpush3.msra.mxu0 %v19_v5  ;;  %p155_p3 = por %p154_p2, %p153_p1 }
   0xb   :  { %136 = vmatprep.subr.mxu0 %v170_v1 }
   0xc   :  { %137 = vmatpush3.msra.mxu0 %v18_v6  ;;  %p156_p4 = pnand %p155_p3, %p149_p0 }
   0xd   :  { %138 = vmatprep.subr.mxu0 %v170_v1 }
   0xe   :  { %139 = vmatpush3.msra.mxu0 %v17_v7 }
   0xf   :  { %140 = vmatprep.subr.mxu0 %v170_v1 }
  0x10   :  { %141 = vmatpush3.msra.mxu0 %v16_v8 }
  0x11   :  { %143 = vmatmul.mubr.msk.f32.vlgmr.msra.gmra.mxu0 %vm25_vm1, %v15_v9 }
  0xd1   :  { %v95_v11 = vpop.f32.mrf.mxu0 }
  0xd2   :  { %v96_v12 = vadd.f32 %v95_v11, %v24_v10 }
  0xd3   :  { %v144_v13 = vpop.f32.mrf.mxu0 }
  0xd4   :  { %v99_v14 = vmax.f32 %v96_v12, 0.0 }
  0xd6   :  { %101 = vst.msk [vmem:[#allocation2] sm:$0x1] %vm100_vm2, %v99_v14 }
  0xd7   :  { %159 = shalt.err (!%p156_p4)
}
  0xd8   :  { %111 = dma.vmem_to_hbm [thread:$0]  %s109_s6, 16, %s229_s3, [#allocation3]  }
  0xd9   :  { %168 = dma.done.wait [#allocation3], 16  }
  0xda   :  { %169 = vsyncadd [#allocation3], 4294967280 }
  0xdb   :  { %115 = vsyncpa [#allocation3], 1 }

</bundles_post_ra>
